<compile_context>
chip_gen: v5e
topology: v5e:2x2
jax: 0.10.0
libtpu: 0.0.40
codegen_flags: <defaults>
</compile_context>

<pallas_src>
import functools

import jax
import jax.numpy as jnp
from jax.experimental import pallas as pl
from jax.experimental.pallas import tpu as pltpu

_TIME_BLOCK_CAP = 16     # timesteps per grid step (amortizes ~0.35us/step overhead)
_PROJ_BLOCK_M = 128      # row tile for the hoisted input projection


def _largest_divisor_le(n, cap):
    for d in range(min(n, cap), 0, -1):
        if n % d == 0:
            return d
    return 1


# ----------------------------------------------------------------------------
# Hoisted input projection:  [gx_fwd | gx_bwd] = x2d @ [W_f | W_b] + [b_f | b_b]
# ----------------------------------------------------------------------------
def _proj_kernel(x_ref, w_ref, b_ref, gf_ref, gb_ref):
    g = jnp.dot(x_ref[...], w_ref[...],
                preferred_element_type=jnp.float32) + b_ref[...]
    gh = gf_ref.shape[-1]
    gf_ref[...] = g[:, :gh].astype(gf_ref.dtype)
    gb_ref[...] = g[:, gh:].astype(gb_ref.dtype)


def _input_projection(x_tbe, wcat, bcat, mxu_dtype):
    """x_tbe: (T,B,E); wcat: (E, 2*G*H); bcat: (1, 2*G*H) -> two (T,B,G*H) f32."""
    T, B, E = x_tbe.shape
    N = wcat.shape[1]
    GH = N // 2
    M = T * B
    BM = _PROJ_BLOCK_M
    Mpad = ((M + BM - 1) // BM) * BM

    x2d = x_tbe.reshape(M, E)
    if Mpad != M:
        x2d = jnp.pad(x2d, ((0, Mpad - M), (0, 0)))
    x2d = x2d.astype(mxu_dtype)
    w = wcat.astype(mxu_dtype)
    b = bcat.astype(jnp.float32)

    gf, gb = pl.pallas_call(
        _proj_kernel,
        out_shape=(jax.ShapeDtypeStruct((Mpad, GH), jnp.float32),
                   jax.ShapeDtypeStruct((Mpad, GH), jnp.float32)),
        grid_spec=pltpu.PrefetchScalarGridSpec(
            num_scalar_prefetch=0,
            grid=(Mpad // BM,),
            in_specs=[
                pl.BlockSpec((BM, E), lambda m: (m, 0)),
                pl.BlockSpec((E, N), lambda m: (0, 0)),   # resident weights
                pl.BlockSpec((1, N), lambda m: (0, 0)),
            ],
            out_specs=(
                pl.BlockSpec((BM, GH), lambda m: (m, 0)),
                pl.BlockSpec((BM, GH), lambda m: (m, 0)),
            )),
        compiler_params=pltpu.CompilerParams(
            dimension_semantics=("parallel",)),
    )(x2d, w, b)
    gf = gf[:M].reshape(T, B, GH)
    gb = gb[:M].reshape(T, B, GH)
    return gf, gb


# ----------------------------------------------------------------------------
# Fused bidirectional LSTM recurrence (PyTorch gate order i, f, g, o).
# gx* already contains x@W_ih + b_ih + b_hh.
# ----------------------------------------------------------------------------
def _lstm_rec_kernel(gxf_ref, gxb_ref, whf_ref, whb_ref,
                     yf_ref, yb_ref, hNf_ref, cNf_ref, hNb_ref, cNb_ref,
                     hf_sc, cf_sc, hb_sc, cb_sc, *, mxu_dtype):
    tb = pl.program_id(0)
    nb = pl.num_programs(0)
    TB = gxf_ref.shape[0]
    H = hf_sc.shape[-1]

    @pl.when(tb == 0)
    def _():
        hf_sc[...] = jnp.zeros_like(hf_sc)
        cf_sc[...] = jnp.zeros_like(cf_sc)
        hb_sc[...] = jnp.zeros_like(hb_sc)
        cb_sc[...] = jnp.zeros_like(cb_sc)

    whf = whf_ref[...]
    whb = whb_ref[...]

    # NOTE: for best VPU behaviour H should be a multiple of 128 so gate slices
    # are lane-aligned; semantics are unchanged either way.
    def cell(g, c):
        i = jax.nn.sigmoid(g[:, 0 * H:1 * H])
        f = jax.nn.sigmoid(g[:, 1 * H:2 * H])
        gg = jnp.tanh(g[:, 2 * H:3 * H])
        o = jax.nn.sigmoid(g[:, 3 * H:4 * H])
        c_new = f * c + i * gg
        h_new = o * jnp.tanh(c_new)
        return h_new, c_new

    def body(s, carry):
        hf, cf, hb, cb = carry
        # forward direction: local timestep s
        gf = gxf_ref[s] + jnp.dot(hf.astype(mxu_dtype), whf,
                                  preferred_element_type=jnp.float32)
        hf, cf = cell(gf, cf)
        yf_ref[s] = hf.astype(yf_ref.dtype)
        # backward direction: local timestep TB-1-s of the reversed block
        j = TB - 1 - s
        gb = gxb_ref[j] + jnp.dot(hb.astype(mxu_dtype), whb,
                                  preferred_element_type=jnp.float32)
        hb, cb = cell(gb, cb)
        yb_ref[j] = hb.astype(yb_ref.dtype)
        return hf, cf, hb, cb

    hf, cf, hb, cb = jax.lax.fori_loop(
        0, TB, body,
        (hf_sc[...], cf_sc[...], hb_sc[...], cb_sc[...]),
        unroll=True)

    hf_sc[...] = hf
    cf_sc[...] = cf
    hb_sc[...] = hb
    cb_sc[...] = cb

    @pl.when(tb == nb - 1)
    def _():
        hNf_ref[...] = hf.astype(hNf_ref.dtype)
        cNf_ref[...] = cf.astype(cNf_ref.dtype)
        hNb_ref[...] = hb.astype(hNb_ref.dtype)
        cNb_ref[...] = cb.astype(cNb_ref.dtype)


def _bilstm_layer(x_tbe, p_fwd, p_bwd, mxu_dtype):
    wih_f, whh_f, b_f = p_fwd
    wih_b, whh_b, b_b = p_bwd
    T, B, _ = x_tbe.shape
    H = whh_f.shape[0]
    G4 = 4 * H

    gxf, gxb = _input_projection(
        x_tbe,
        jnp.concatenate([wih_f, wih_b], axis=1),
        jnp.concatenate([b_f, b_b], axis=1),
        mxu_dtype)

    TB = _largest_divisor_le(T, _TIME_BLOCK_CAP)
    NB = T // TB
    whf = whh_f.astype(mxu_dtype)
    whb = whh_b.astype(mxu_dtype)
    odt = x_tbe.dtype

    kernel = functools.partial(_lstm_rec_kernel, mxu_dtype=mxu_dtype)
    yf, yb, hNf, cNf, hNb, cNb = pl.pallas_call(
        kernel,
        out_shape=(jax.ShapeDtypeStruct((T, B, H), odt),
                   jax.ShapeDtypeStruct((T, B, H), odt),
                   jax.ShapeDtypeStruct((B, H), odt),
                   jax.ShapeDtypeStruct((B, H), odt),
                   jax.ShapeDtypeStruct((B, H), odt),
                   jax.ShapeDtypeStruct((B, H), odt)),
        grid_spec=pltpu.PrefetchScalarGridSpec(
            num_scalar_prefetch=0,
            grid=(NB,),
            in_specs=[
                pl.BlockSpec((TB, B, G4), lambda t: (t, 0, 0)),
                pl.BlockSpec((TB, B, G4), lambda t, nb=NB: (nb - 1 - t, 0, 0)),
                pl.BlockSpec((H, G4), lambda t: (0, 0)),      # W_hh fwd resident
                pl.BlockSpec((H, G4), lambda t: (0, 0)),      # W_hh bwd resident
            ],
            out_specs=(
                pl.BlockSpec((TB, B, H), lambda t: (t, 0, 0)),
                pl.BlockSpec((TB, B, H), lambda t, nb=NB: (nb - 1 - t, 0, 0)),
                pl.BlockSpec((B, H), lambda t: (0, 0)),
                pl.BlockSpec((B, H), lambda t: (0, 0)),
                pl.BlockSpec((B, H), lambda t: (0, 0)),
                pl.BlockSpec((B, H), lambda t: (0, 0)),
            ),
            scratch_shapes=[pltpu.VMEM((B, H), jnp.float32)] * 4),
        compiler_params=pltpu.CompilerParams(
            dimension_semantics=("arbitrary",)),   # time is sequential
    )(gxf, gxb, whf, whb)
    return yf, yb, (hNf, cNf), (hNb, cNb)


# ----------------------------------------------------------------------------
# Fused bidirectional GRU recurrence (PyTorch gate order r, z, n).
# gx* contains x@W_ih + b_ih; b_hh is applied to h@W_hh inside (needed for n).
# ----------------------------------------------------------------------------
def _gru_rec_kernel(gxf_ref, gxb_ref, whf_ref, whb_ref, bhf_ref, bhb_ref,
                    yf_ref, yb_ref, hNf_ref, hNb_ref,
                    hf_sc, hb_sc, *, mxu_dtype):
    tb = pl.program_id(0)
    nb = pl.num_programs(0)
    TB = gxf_ref.shape[0]
    H = hf_sc.shape[-1]

    @pl.when(tb == 0)
    def _():
        hf_sc[...] = jnp.zeros_like(hf_sc)
        hb_sc[...] = jnp.zeros_like(hb_sc)

    whf = whf_ref[...]
    whb = whb_ref[...]
    bhf = bhf_ref[...]
    bhb = bhb_ref[...]

    def cell(gx, gh, h):
        r = jax.nn.sigmoid(gx[:, 0 * H:1 * H] + gh[:, 0 * H:1 * H])
        z = jax.nn.sigmoid(gx[:, 1 * H:2 * H] + gh[:, 1 * H:2 * H])
        n = jnp.tanh(gx[:, 2 * H:3 * H] + r * gh[:, 2 * H:3 * H])
        return (1.0 - z) * n + z * h

    def body(s, carry):
        hf, hb = carry
        ghf = jnp.dot(hf.astype(mxu_dtype), whf,
                      preferred_element_type=jnp.float32) + bhf
        hf = cell(gxf_ref[s], ghf, hf)
        yf_ref[s] = hf.astype(yf_ref.dtype)

        j = TB - 1 - s
        ghb = jnp.dot(hb.astype(mxu_dtype), whb,
                      preferred_element_type=jnp.float32) + bhb
        hb = cell(gxb_ref[j], ghb, hb)
        yb_ref[j] = hb.astype(yb_ref.dtype)
        return hf, hb

    hf, hb = jax.lax.fori_loop(0, TB, body, (hf_sc[...], hb_sc[...]),
                               unroll=True)
    hf_sc[...] = hf
    hb_sc[...] = hb

    @pl.when(tb == nb - 1)
    def _():
        hNf_ref[...] = hf.astype(hNf_ref.dtype)
        hNb_ref[...] = hb.astype(hNb_ref.dtype)


def _bigru_layer(x_tbe, p_fwd, p_bwd, mxu_dtype):
    wih_f, whh_f, bih_f, bhh_f = p_fwd
    wih_b, whh_b, bih_b, bhh_b = p_bwd
    T, B, _ = x_tbe.shape
    H = whh_f.shape[0]
    G3 = 3 * H

    gxf, gxb = _input_projection(
        x_tbe,
        jnp.concatenate([wih_f, wih_b], axis=1),
        jnp.concatenate([bih_f, bih_b], axis=1),
        mxu_dtype)

    TB = _largest_divisor_le(T, _TIME_BLOCK_CAP)
    NB = T // TB
    whf = whh_f.astype(mxu_dtype)
    whb = whh_b.astype(mxu_dtype)
    odt = x_tbe.dtype

    kernel = functools.partial(_gru_rec_kernel, mxu_dtype=mxu_dtype)
    yf, yb, hNf, hNb = pl.pallas_call(
        kernel,
        out_shape=(jax.ShapeDtypeStruct((T, B, H), odt),
                   jax.ShapeDtypeStruct((T, B, H), odt),
                   jax.ShapeDtypeStruct((B, H), odt),
                   jax.ShapeDtypeStruct((B, H), odt)),
        grid_spec=pltpu.PrefetchScalarGridSpec(
            num_scalar_prefetch=0,
            grid=(NB,),
            in_specs=[
                pl.BlockSpec((TB, B, G3), lambda t: (t, 0, 0)),
                pl.BlockSpec((TB, B, G3), lambda t, nb=NB: (nb - 1 - t, 0, 0)),
                pl.BlockSpec((H, G3), lambda t: (0, 0)),
                pl.BlockSpec((H, G3), lambda t: (0, 0)),
                pl.BlockSpec((1, G3), lambda t: (0, 0)),
                pl.BlockSpec((1, G3), lambda t: (0, 0)),
            ],
            out_specs=(
                pl.BlockSpec((TB, B, H), lambda t: (t, 0, 0)),
                pl.BlockSpec((TB, B, H), lambda t, nb=NB: (nb - 1 - t, 0, 0)),
                pl.BlockSpec((B, H), lambda t: (0, 0)),
                pl.BlockSpec((B, H), lambda t: (0, 0)),
            ),
            scratch_shapes=[pltpu.VMEM((B, H), jnp.float32)] * 2),
        compiler_params=pltpu.CompilerParams(
            dimension_semantics=("arbitrary",)),
    )(gxf, gxb, whf, whb, bhh_f, bhh_b)
    return yf, yb, hNf, hNb


# ----------------------------------------------------------------------------
# EncoderRNN.forward: bidirectional, multi-layer, batch_first, zero init state.
# ----------------------------------------------------------------------------
def encoder_rnn_forward(x_bte, params, rnn_network, mxu_dtype=jnp.float32):
    """x_bte: (B, T, E). Returns (hy, (ht, ct)) for lstm, (hy, ht) for gru."""
    x_tbe = jnp.transpose(x_bte, (1, 0, 2))          # time-major
    ht_list, ct_list = [], []
    layer_in = x_tbe
    for lp in params:                                 # {'fwd': ..., 'bwd': ...}
        if rnn_network == "lstm":
            yf, yb, (hf, cf), (hb, cb) = _bilstm_layer(
                layer_in, lp["fwd"], lp["bwd"], mxu_dtype)
            ct_list += [cf, cb]
        else:
            yf, yb, hf, hb = _bigru_layer(layer_in, lp["fwd"], lp["bwd"], mxu_dtype)
        ht_list += [hf, hb]
        layer_in = jnp.concatenate([yf, yb], axis=-1)  # (T, B, 2H)
    hy = jnp.transpose(layer_in, (1, 0, 2))            # (B, T, 2H)
    ht = jnp.stack(ht_list, axis=0)                    # (2*nLayers, B, H)
    if rnn_network == "lstm":
        return hy, (ht, jnp.stack(ct_list, axis=0))
    return hy, ht


def init_params(key, emb_dim, hidden_size, n_layers, rnn_network):
    """Deterministic uniform(-1/sqrt(H), 1/sqrt(H)) init, like torch.nn.LSTM/GRU."""
    n_gates = 4 if rnn_network == "lstm" else 3
    k = 1.0 / jnp.sqrt(hidden_size)
    params = []
    for l in range(n_layers):
        in_dim = emb_dim if l == 0 else 2 * hidden_size
        layer = {}
        for d in ("fwd", "bwd"):
            key, k1, k2, k3, k4 = jax.random.split(key, 5)
            wih = jax.random.uniform(k1, (in_dim, n_gates * hidden_size),
                                     jnp.float32, -k, k)
            whh = jax.random.uniform(k2, (hidden_size, n_gates * hidden_size),
                                     jnp.float32, -k, k)
            bih = jax.random.uniform(k3, (1, n_gates * hidden_size),
                                     jnp.float32, -k, k)
            bhh = jax.random.uniform(k4, (1, n_gates * hidden_size),
                                     jnp.float32, -k, k)
            if rnn_network == "lstm":
                layer[d] = (wih, whh, bih + bhh)        # biases fuse for LSTM
            else:
                layer[d] = (wih, whh, bih, bhh)         # GRU needs them separate
        params.append(layer)
    return params


# ----------------------------------------------------------------------------
# Pure-JAX references (per-timestep loop, HIGHEST precision matmuls).
# ----------------------------------------------------------------------------
def _lstm_dir_ref(x_tbe, wih, whh, bias):
    T, B, _ = x_tbe.shape
    H = whh.shape[0]
    hp = jax.lax.Precision.HIGHEST
    h = jnp.zeros((B, H), jnp.float32)
    c = jnp.zeros((B, H), jnp.float32)
    ys = []
    for t in range(T):
        g = (jnp.dot(x_tbe[t], wih, precision=hp)
             + jnp.dot(h, whh, precision=hp) + bias)
        i = jax.nn.sigmoid(g[:, 0 * H:1 * H])
        f = jax.nn.sigmoid(g[:, 1 * H:2 * H])
        gg = jnp.tanh(g[:, 2 * H:3 * H])
        o = jax.nn.sigmoid(g[:, 3 * H:4 * H])
        c = f * c + i * gg
        h = o * jnp.tanh(c)
        ys.append(h)
    return jnp.stack(ys), (h, c)


def _gru_dir_ref(x_tbe, wih, whh, bih, bhh):
    T, B, _ = x_tbe.shape
    H = whh.shape[0]
    hp = jax.lax.Precision.HIGHEST
    h = jnp.zeros((B, H), jnp.float32)
    ys = []
    for t in range(T):
        gi = jnp.dot(x_tbe[t], wih, precision=hp) + bih
        gh = jnp.dot(h, whh, precision=hp) + bhh
        r = jax.nn.sigmoid(gi[:, 0 * H:1 * H] + gh[:, 0 * H:1 * H])
        z = jax.nn.sigmoid(gi[:, 1 * H:2 * H] + gh[:, 1 * H:2 * H])
        n = jnp.tanh(gi[:, 2 * H:3 * H] + r * gh[:, 2 * H:3 * H])
        h = (1.0 - z) * n + z * h
        ys.append(h)
    return jnp.stack(ys), h


def encoder_rnn_ref(x_bte, params, rnn_network):
    x_tbe = jnp.transpose(x_bte, (1, 0, 2))
    ht_list, ct_list = [], []
    layer_in = x_tbe
    for lp in params:
        if rnn_network == "lstm":
            yf, (hf, cf) = _lstm_dir_ref(layer_in, *lp["fwd"])
            yb_rev, (hb, cb) = _lstm_dir_ref(layer_in[::-1], *lp["bwd"])
            ct_list += [cf, cb]
        else:
            yf, hf = _gru_dir_ref(layer_in, *lp["fwd"])
            yb_rev, hb = _gru_dir_ref(layer_in[::-1], *lp["bwd"])
        ht_list += [hf, hb]
        layer_in = jnp.concatenate([yf, yb_rev[::-1]], axis=-1)
    hy = jnp.transpose(layer_in, (1, 0, 2))
    ht = jnp.stack(ht_list, axis=0)
    if rnn_network == "lstm":
        return hy, (ht, jnp.stack(ct_list, axis=0))
    return hy, ht


if __name__ == "__main__":
    B, T, E, H, L = 2, 8, 32, 32, 2

    key = jax.random.PRNGKey(0)
    kx, kp_lstm, kp_gru = jax.random.split(key, 3)
    x = jax.random.normal(kx, (B, T, E), jnp.float32)

    # ---- LSTM, f32 MXU path -------------------------------------------------
    p_lstm = init_params(kp_lstm, E, H, L, "lstm")
    hy, (ht, ct) = encoder_rnn_forward(x, p_lstm, "lstm", mxu_dtype=jnp.float32)
    jax.block_until_ready((hy, ht, ct))
    hy_r, (ht_r, ct_r) = encoder_rnn_ref(x, p_lstm, "lstm")
    assert hy.shape == (B, T, 2 * H) and ht.shape == (2 * L, B, H) and ct.shape == (2 * L, B, H)
    assert jnp.allclose(hy, hy_r, atol=5e-3, rtol=5e-3)
    assert jnp.allclose(ht, ht_r, atol=5e-3, rtol=5e-3)
    assert jnp.allclose(ct, ct_r, atol=5e-3, rtol=5e-3)

    # ---- GRU, f32 MXU path --------------------------------------------------
    p_gru = init_params(kp_gru, E, H, L, "gru")
    hy_g, ht_g = encoder_rnn_forward(x, p_gru, "gru", mxu_dtype=jnp.float32)
    jax.block_until_ready((hy_g, ht_g))
    hy_gr, ht_gr = encoder_rnn_ref(x, p_gru, "gru")
    assert hy_g.shape == (B, T, 2 * H) and ht_g.shape == (2 * L, B, H)
    assert jnp.allclose(hy_g, hy_gr, atol=5e-3, rtol=5e-3)
    assert jnp.allclose(ht_g, ht_gr, atol=5e-3, rtol=5e-3)

    # ---- LSTM, bf16 MXU inputs (fast path for v6e/v7x; f32 accumulate/state) -
    hy_b, (ht_b, ct_b) = encoder_rnn_forward(x, p_lstm, "lstm",
                                             mxu_dtype=jnp.bfloat16)
    jax.block_until_ready((hy_b, ht_b, ct_b))
    assert hy_b.shape == (B, T, 2 * H)
    assert bool(jnp.all(jnp.isfinite(hy_b)))
    assert jnp.allclose(hy_b, hy_r, atol=0.15, rtol=0.15)
    assert jnp.allclose(ht_b, ht_r, atol=0.15, rtol=0.15)

    print("KERNEL_OK")
</pallas_src>

<mosaic_0001>
module attributes {stable_mosaic.version = 11 : i64} {
  func.func @_proj_kernel(%arg0: i32, %arg1: memref<128x32xf32, #tpu.memory_space<vmem>>, %arg2: memref<32x256xf32, #tpu.memory_space<vmem>>, %arg3: memref<1x256xf32, #tpu.memory_space<vmem>>, %arg4: memref<128x128xf32, #tpu.memory_space<vmem>>, %arg5: memref<128x128xf32, #tpu.memory_space<vmem>>) attributes {dimension_semantics = [#tpu.dimension_semantics<parallel>], iteration_bounds = array<i64: 1>, scalar_prefetch = 0 : i64, scratch_operands = 0 : i64, tpu.core_type = #tpu.core_type<tc>, window_params = [{transform_indices = @transform_0, window_bounds = array<i64: 128, 32>}, {pipeline_mode = #tpu.pipeline_mode<synchronous>, transform_indices = @transform_1, window_bounds = array<i64: 32, 256>}, {pipeline_mode = #tpu.pipeline_mode<synchronous>, transform_indices = @transform_2, window_bounds = array<i64: 1, 256>}, {transform_indices = @transform_3, window_bounds = array<i64: 128, 128>}, {transform_indices = @transform_4, window_bounds = array<i64: 128, 128>}]} {
    %c0 = arith.constant 0 : index
    %c0_0 = arith.constant 0 : index
    %0 = vector.load %arg1[%c0, %c0_0] : memref<128x32xf32, #tpu.memory_space<vmem>>, vector<128x32xf32>
    %c0_1 = arith.constant 0 : index
    %c0_2 = arith.constant 0 : index
    %1 = vector.load %arg2[%c0_1, %c0_2] : memref<32x256xf32, #tpu.memory_space<vmem>>, vector<32x256xf32>
    %cst = arith.constant dense<0.000000e+00> : vector<128x256xf32>
    %2 = tpu.matmul %0, %1, %cst {dimension_numbers = #tpu.dot_dimension_numbers<[1], [0], [0], [1], [0, 0, 1, 1], [], []>} : vector<128x32xf32>, vector<32x256xf32>, vector<128x256xf32> -> vector<128x256xf32>
    %c0_3 = arith.constant 0 : index
    %c0_4 = arith.constant 0 : index
    %3 = vector.load %arg3[%c0_3, %c0_4] : memref<1x256xf32, #tpu.memory_space<vmem>>, vector<1x256xf32>
    %4 = vector.broadcast %3 : vector<1x256xf32> to vector<128x256xf32>
    %5 = arith.addf %2, %4 : vector<128x256xf32>
    %6 = vector.extract_strided_slice %5 {offsets = [0, 0], sizes = [128, 128], strides = [1, 1]} : vector<128x256xf32> to vector<128x128xf32>
    %c0_5 = arith.constant 0 : index
    %c0_6 = arith.constant 0 : index
    %7 = vector.load %arg4[%c0_5, %c0_6] : memref<128x128xf32, #tpu.memory_space<vmem>>, vector<128x128xf32>
    tpu.vector_store %arg4[%c0_5, %c0_6], %6 {strides = array<i32>} : memref<128x128xf32, #tpu.memory_space<vmem>>, vector<128x128xf32>,
    %8 = vector.extract_strided_slice %5 {offsets = [0, 128], sizes = [128, 128], strides = [1, 1]} : vector<128x256xf32> to vector<128x128xf32>
    %c0_7 = arith.constant 0 : index
    %c0_8 = arith.constant 0 : index
    %9 = vector.load %arg5[%c0_7, %c0_8] : memref<128x128xf32, #tpu.memory_space<vmem>>, vector<128x128xf32>
    tpu.vector_store %arg5[%c0_7, %c0_8], %8 {strides = array<i32>} : memref<128x128xf32, #tpu.memory_space<vmem>>, vector<128x128xf32>,
    return
  }
  func.func @transform_0(%arg0: i32) -> (i32, i32) {
    %c0_i32 = arith.constant 0 : i32
    %c0_i32_0 = arith.constant 0 : i32
    return %arg0, %c0_i32 : i32, i32
  }
  func.func @transform_1(%arg0: i32) -> (i32, i32) {
    %c0_i32 = arith.constant 0 : i32
    %c0_i32_0 = arith.constant 0 : i32
    %c0_i32_1 = arith.constant 0 : i32
    return %c0_i32, %c0_i32_0 : i32, i32
  }
  func.func @transform_2(%arg0: i32) -> (i32, i32) {
    %c0_i32 = arith.constant 0 : i32
    %c0_i32_0 = arith.constant 0 : i32
    %c0_i32_1 = arith.constant 0 : i32
    return %c0_i32, %c0_i32_0 : i32, i32
  }
  func.func @transform_3(%arg0: i32) -> (i32, i32) {
    %c0_i32 = arith.constant 0 : i32
    %c0_i32_0 = arith.constant 0 : i32
    return %arg0, %c0_i32 : i32, i32
  }
  func.func @transform_4(%arg0: i32) -> (i32, i32) {
    %c0_i32 = arith.constant 0 : i32
    %c0_i32_0 = arith.constant 0 : i32
    return %arg0, %c0_i32 : i32, i32
  }
}

</mosaic_0001>

<bundles_post_ra>
// kernel: tpu_custom_call.1
= control target key start
LH: loop header
LB: loop body
LE: loop exit
PB: predicated region body
PF: predicated region fallthrough
CT: control target
= control target key end

     0   :  { %10 = vsyncpa [#allocation3], 0  ;;  %vm48_vm0 = vcmask 261120   ;;  %s569_s0 = inlined_call_operand.vmem [shape: f32[128,32], index: 0, kind: input, shape index: {}]   ;;  %s570_s1 = inlined_call_operand.vmem [shape: f32[32,256], index: 1, kind: input, shape index: {}]   ;;  %s571_s2 = inlined_call_operand.vmem [shape: f32[1,256], index: 2, kind: input, shape index: {}]   ;;  %s572_s3 = inlined_call_operand.hbm [shape: f32[128,128], index: 3, kind: output, shape index: {0}]   ;;  %s573_s4 = inlined_call_operand.hbm [shape: f32[128,128], index: 4, kind: output, shape index: {1}]  }
   0x1   :  { %v40_v0 = vld [vmem:[%s570_s1 + $0x30] sm:$0xff]  ;;  %v41_v1 = vld [vmem:[%s570_s1 + $0x38] sm:$0xff]  ;;  %v38_v2 = vld [vmem:[%s570_s1 + $0x20] sm:$0xff] }
   0x2   :  { %327 = vmatpush.msra.mxu2 %v40_v0  ;;  %331 = vmatpush.msra.mxu3 %v41_v1  ;;  %v39_v3 = vld [vmem:[%s570_s1 + $0x28] sm:$0xff]  ;;  %v36_v4 = vld [vmem:[%s570_s1 + $0x10] sm:$0xff]  ;;  %v37_v5 = vld [vmem:[%s570_s1 + $0x18] sm:$0xff] }
   0x3   :  { %109 = vmatpush.msra.mxu0 %v40_v0  ;;  %174 = vmatpush.msra.mxu1 %v41_v1  ;;  %v34_v6 = vld [vmem:[%s570_s1] sm:$0xff]  ;;  %v35_v7 = vld [vmem:[%s570_s1 + $0x8] sm:$0xff] }
   0x4   :  { %328 = vmatpush.msra.mxu2 %v38_v2  ;;  %332 = vmatpush.msra.mxu3 %v39_v3  ;;  %v26_v8 = vld [vmem:[%s569_s0 + $0x40] sm:$0xff] }
   0x5   :  { %110 = vmatpush.msra.mxu0 %v38_v2  ;;  %175 = vmatpush.msra.mxu1 %v39_v3 }
   0x6   :  { %329 = vmatpush.msra.mxu2 %v36_v4  ;;  %333 = vmatpush.msra.mxu3 %v37_v5 }
   0x7   :  { %11 = vsyncpa [#allocation5], 0  ;;  %111 = vmatpush.msra.mxu0 %v36_v4  ;;  %176 = vmatpush.msra.mxu1 %v37_v5  ;;  %v18_v9 = vld [vmem:[%s569_s0] sm:$0xff]  ;;  %v27_v10 = vld [vmem:[%s569_s0 + $0x48] sm:$0xff]  ;;  %s265_s13 = sshll.u32 %s572_s3, 4  ;;  %s392_s14 = smov [#allocation4]   ;;  %s266_s13 = int_to_ptr.hbm [resolvable:$true] %s265_s13 }
   0x8   :  { %330 = vmatpush.msra.mxu2 %v34_v6  ;;  %334 = vmatpush.msra.mxu3 %v35_v7  ;;  %v19_v11 = vld [vmem:[%s569_s0 + $0x8] sm:$0xff]  ;;  %v28_v12 = vld [vmem:[%s569_s0 + $0x50] sm:$0xff]  ;;  %v29_v14 = vld [vmem:[%s569_s0 + $0x58] sm:$0xff]  ;;  %s276_s15 = sshll.u32 %s392_s14, 4  ;;  %s278_s18 = sshll.u32 %s573_s4, 4  ;;  %s277_s15 = int_to_ptr.vmem [resolvable:$true] %s276_s15  ;;  %s279_s18 = int_to_ptr.hbm [resolvable:$true] %s278_s18 }
   0x9   :  { %303 = vmatmul.msk.f32.vlgmr.msra.gmra.mxu2 %vm48_vm0, %v26_v8  ;;  %319 = vmatmul.msk.f32.vlgmr.msra.gmra.mxu3 %vm48_vm0, %v26_v8  ;;  %v20_v13 = vld [vmem:[%s569_s0 + $0x10] sm:$0xff]  ;;  %v21_v15 = vld [vmem:[%s569_s0 + $0x18] sm:$0xff]  ;;  %v30_v16 = vld [vmem:[%s569_s0 + $0x60] sm:$0xff]  ;;  %s393_s3 = smov 128   ;;  %s394_s19 = smov 8  }
   0xa   :  { %112 = vmatpush.msra.mxu0 %v34_v6  ;;  %177 = vmatpush.msra.mxu1 %v35_v7  ;;  %v22_v17 = vld [vmem:[%s569_s0 + $0x20] sm:$0xff]  ;;  %v31_v18 = vld [vmem:[%s569_s0 + $0x68] sm:$0xff]  ;;  %v32_v20 = vld [vmem:[%s569_s0 + $0x70] sm:$0xff] }
   0xb   :  { %295 = vmatmul.msk.f32.vlgmr.msra.gmra.mxu0 %vm48_vm0, %v18_v9  ;;  %311 = vmatmul.msk.f32.vlgmr.msra.gmra.mxu1 %vm48_vm0, %v18_v9  ;;  %v23_v19 = vld [vmem:[%s569_s0 + $0x28] sm:$0xff]  ;;  %v24_v21 = vld [vmem:[%s569_s0 + $0x30] sm:$0xff]  ;;  %v33_v22 = vld [vmem:[%s569_s0 + $0x78] sm:$0xff] }
   0xc   :  { %v25_v23 = vld [vmem:[%s569_s0 + $0x38] sm:$0xff]  ;;  %v42_v24 = vld [vmem:[%s571_s2] sm:$0x3]  ;;  %s391_s0 = smov [#allocation2]  }
   0xd   :  { %v527_v25 = vperm.slane %v42_v24, 0  ;;  %v529_v26 = vperm.slane %v42_v24, 1  ;;  %s263_s2 = sshll.u32 %s391_s0, 4  ;;  %s264_s2 = int_to_ptr.vmem [resolvable:$true] %s263_s2 }
  0x11   :  { %304 = vmatmul.msk.f32.gmra.mxu2 %vm48_vm0, %v27_v10  ;;  %320 = vmatmul.msk.f32.gmra.mxu3 %vm48_vm0, %v27_v10 }
  0x13   :  { %296 = vmatmul.msk.f32.gmra.mxu0 %vm48_vm0, %v19_v11  ;;  %312 = vmatmul.msk.f32.gmra.mxu1 %vm48_vm0, %v19_v11 }
  0x19   :  { %305 = vmatmul.msk.f32.gmra.mxu2 %vm48_vm0, %v28_v12  ;;  %321 = vmatmul.msk.f32.gmra.mxu3 %vm48_vm0, %v28_v12 }
  0x1b   :  { %297 = vmatmul.msk.f32.gmra.mxu0 %vm48_vm0, %v20_v13  ;;  %313 = vmatmul.msk.f32.gmra.mxu1 %vm48_vm0, %v20_v13 }
  0x21   :  { %306 = vmatmul.msk.f32.gmra.mxu2 %vm48_vm0, %v29_v14  ;;  %322 = vmatmul.msk.f32.gmra.mxu3 %vm48_vm0, %v29_v14 }
  0x23   :  { %298 = vmatmul.msk.f32.gmra.mxu0 %vm48_vm0, %v21_v15  ;;  %314 = vmatmul.msk.f32.gmra.mxu1 %vm48_vm0, %v21_v15 }
  0x29   :  { %307 = vmatmul.msk.f32.gmra.mxu2 %vm48_vm0, %v30_v16  ;;  %323 = vmatmul.msk.f32.gmra.mxu3 %vm48_vm0, %v30_v16 }
  0x2b   :  { %299 = vmatmul.msk.f32.gmra.mxu0 %vm48_vm0, %v22_v17  ;;  %315 = vmatmul.msk.f32.gmra.mxu1 %vm48_vm0, %v22_v17 }
  0x31   :  { %308 = vmatmul.msk.f32.gmra.mxu2 %vm48_vm0, %v31_v18  ;;  %324 = vmatmul.msk.f32.gmra.mxu3 %vm48_vm0, %v31_v18 }
  0x33   :  { %300 = vmatmul.msk.f32.gmra.mxu0 %vm48_vm0, %v23_v19  ;;  %316 = vmatmul.msk.f32.gmra.mxu1 %vm48_vm0, %v23_v19 }
  0x39   :  { %309 = vmatmul.msk.f32.gmra.mxu2 %vm48_vm0, %v32_v20  ;;  %325 = vmatmul.msk.f32.gmra.mxu3 %vm48_vm0, %v32_v20 }
  0x3b   :  { %301 = vmatmul.msk.f32.gmra.mxu0 %vm48_vm0, %v24_v21  ;;  %317 = vmatmul.msk.f32.gmra.mxu1 %vm48_vm0, %v24_v21 }
  0x41   :  { %310 = vmatmul.msk.f32.gmra.mxu2 %vm48_vm0, %v33_v22  ;;  %326 = vmatmul.msk.f32.gmra.mxu3 %vm48_vm0, %v33_v22 }
  0x43   :  { %302 = vmatmul.msk.f32.gmra.mxu0 %vm48_vm0, %v25_v23  ;;  %318 = vmatmul.msk.f32.gmra.mxu1 %vm48_vm0, %v25_v23 }
  0x88   :  { %v114_v27 = vpop.f32.mrf.mxu0  ;;  %v179_v28 = vpop.f32.mrf.mxu1 }
  0x89   :  { %v115_v29 = vadd.f32 %v114_v27, %v527_v25  ;;  %v180_v30 = vadd.f32 %v179_v28, %v529_v26 }
  0x8b   :  { %227 = vst [vmem:[#allocation2] sm:$0xff] %v115_v29 }
  0x8c   :  { %v138_v31 = vpop.f32.mrf.mxu2  ;;  %243 = vst [vmem:[#allocation4] sm:$0xff] %v180_v30  ;;  %v203_v32 = vpop.f32.mrf.mxu3 }
  0x8d   :  { %v139_v33 = vadd.f32 %v138_v31, %v527_v25  ;;  %v204_v34 = vadd.f32 %v203_v32, %v529_v26 }
  0x8f   :  { %235 = vst [vmem:[#allocation2 + $0x40] sm:$0xff] %v139_v33 }
  0x90   :  { %251 = vst [vmem:[#allocation4 + $0x40] sm:$0xff] %v204_v34  ;;  %v117_v35 = vpop.f32.mrf.mxu0  ;;  %v182_v36 = vpop.f32.mrf.mxu1 }
  0x91   :  { %v118_v37 = vadd.f32 %v117_v35, %v527_v25  ;;  %v183_v38 = vadd.f32 %v182_v36, %v529_v26 }
  0x93   :  { %228 = vst [vmem:[#allocation2 + $0x8] sm:$0xff] %v118_v37 }
  0x94   :  { %v141_v39 = vpop.f32.mrf.mxu2  ;;  %244 = vst [vmem:[#allocation4 + $0x8] sm:$0xff] %v183_v38  ;;  %v206_v40 = vpop.f32.mrf.mxu3 }
  0x95   :  { %v142_v41 = vadd.f32 %v141_v39, %v527_v25  ;;  %v207_v42 = vadd.f32 %v206_v40, %v529_v26 }
  0x97   :  { %236 = vst [vmem:[#allocation2 + $0x48] sm:$0xff] %v142_v41 }
  0x98   :  { %252 = vst [vmem:[#allocation4 + $0x48] sm:$0xff] %v207_v42  ;;  %v120_v43 = vpop.f32.mrf.mxu0  ;;  %v185_v44 = vpop.f32.mrf.mxu1 }
  0x99   :  { %v121_v45 = vadd.f32 %v120_v43, %v527_v25  ;;  %v186_v46 = vadd.f32 %v185_v44, %v529_v26 }
  0x9b   :  { %229 = vst [vmem:[#allocation2 + $0x10] sm:$0xff] %v121_v45 }
  0x9c   :  { %v144_v47 = vpop.f32.mrf.mxu2  ;;  %245 = vst [vmem:[#allocation4 + $0x10] sm:$0xff] %v186_v46  ;;  %v209_v48 = vpop.f32.mrf.mxu3 }
  0x9d   :  { %v145_v49 = vadd.f32 %v144_v47, %v527_v25  ;;  %v210_v50 = vadd.f32 %v209_v48, %v529_v26 }
  0x9f   :  { %237 = vst [vmem:[#allocation2 + $0x50] sm:$0xff] %v145_v49 }
  0xa0   :  { %253 = vst [vmem:[#allocation4 + $0x50] sm:$0xff] %v210_v50  ;;  %v123_v51 = vpop.f32.mrf.mxu0  ;;  %v188_v52 = vpop.f32.mrf.mxu1 }
  0xa1   :  { %v124_v53 = vadd.f32 %v123_v51, %v527_v25  ;;  %v189_v54 = vadd.f32 %v188_v52, %v529_v26 }
  0xa3   :  { %230 = vst [vmem:[#allocation2 + $0x18] sm:$0xff] %v124_v53 }
  0xa4   :  { %v147_v55 = vpop.f32.mrf.mxu2  ;;  %246 = vst [vmem:[#allocation4 + $0x18] sm:$0xff] %v189_v54  ;;  %v212_v56 = vpop.f32.mrf.mxu3 }
  0xa5   :  { %v148_v57 = vadd.f32 %v147_v55, %v527_v25  ;;  %v213_v58 = vadd.f32 %v212_v56, %v529_v26 }
  0xa7   :  { %238 = vst [vmem:[#allocation2 + $0x58] sm:$0xff] %v148_v57 }
  0xa8   :  { %254 = vst [vmem:[#allocation4 + $0x58] sm:$0xff] %v213_v58  ;;  %v126_v59 = vpop.f32.mrf.mxu0  ;;  %v191_v60 = vpop.f32.mrf.mxu1 }
  0xa9   :  { %v127_v61 = vadd.f32 %v126_v59, %v527_v25  ;;  %v192_v62 = vadd.f32 %v191_v60, %v529_v26 }
  0xab   :  { %231 = vst [vmem:[#allocation2 + $0x20] sm:$0xff] %v127_v61 }
  0xac   :  { %v150_v63 = vpop.f32.mrf.mxu2  ;;  %247 = vst [vmem:[#allocation4 + $0x20] sm:$0xff] %v192_v62  ;;  %v215_v0 = vpop.f32.mrf.mxu3 }
  0xad   :  { %v151_v1 = vadd.f32 %v150_v63, %v527_v25  ;;  %v216_v2 = vadd.f32 %v215_v0, %v529_v26 }
  0xaf   :  { %239 = vst [vmem:[#allocation2 + $0x60] sm:$0xff] %v151_v1 }
  0xb0   :  { %255 = vst [vmem:[#allocation4 + $0x60] sm:$0xff] %v216_v2  ;;  %v129_v3 = vpop.f32.mrf.mxu0  ;;  %v194_v4 = vpop.f32.mrf.mxu1 }
  0xb1   :  { %v130_v5 = vadd.f32 %v129_v3, %v527_v25  ;;  %v195_v6 = vadd.f32 %v194_v4, %v529_v26 }
  0xb3   :  { %232 = vst [vmem:[#allocation2 + $0x28] sm:$0xff] %v130_v5 }
  0xb4   :  { %v153_v7 = vpop.f32.mrf.mxu2  ;;  %248 = vst [vmem:[#allocation4 + $0x28] sm:$0xff] %v195_v6  ;;  %v218_v8 = vpop.f32.mrf.mxu3 }
  0xb5   :  { %v154_v9 = vadd.f32 %v153_v7, %v527_v25  ;;  %v219_v10 = vadd.f32 %v218_v8, %v529_v26 }
  0xb7   :  { %240 = vst [vmem:[#allocation2 + $0x68] sm:$0xff] %v154_v9 }
  0xb8   :  { %256 = vst [vmem:[#allocation4 + $0x68] sm:$0xff] %v219_v10  ;;  %v132_v11 = vpop.f32.mrf.mxu0  ;;  %v197_v12 = vpop.f32.mrf.mxu1 }
  0xb9   :  { %v133_v13 = vadd.f32 %v132_v11, %v527_v25  ;;  %v198_v14 = vadd.f32 %v197_v12, %v529_v26 }
  0xbb   :  { %233 = vst [vmem:[#allocation2 + $0x30] sm:$0xff] %v133_v13 }
  0xbc   :  { %v156_v15 = vpop.f32.mrf.mxu2  ;;  %249 = vst [vmem:[#allocation4 + $0x30] sm:$0xff] %v198_v14  ;;  %v221_v16 = vpop.f32.mrf.mxu3 }
  0xbd   :  { %v157_v17 = vadd.f32 %v156_v15, %v527_v25  ;;  %v222_v18 = vadd.f32 %v221_v16, %v529_v26 }
  0xbf   :  { %241 = vst [vmem:[#allocation2 + $0x70] sm:$0xff] %v157_v17 }
  0xc0   :  { %257 = vst [vmem:[#allocation4 + $0x70] sm:$0xff] %v222_v18  ;;  %v135_v19 = vpop.f32.mrf.mxu0  ;;  %v200_v20 = vpop.f32.mrf.mxu1 }
  0xc1   :  { %v136_v21 = vadd.f32 %v135_v19, %v527_v25  ;;  %v201_v22 = vadd.f32 %v200_v20, %v529_v26 }
  0xc3   :  { %234 = vst [vmem:[#allocation2 + $0x38] sm:$0xff] %v136_v21 }
  0xc4   :  { %v159_v23 = vpop.f32.mrf.mxu2  ;;  %250 = vst [vmem:[#allocation4 + $0x38] sm:$0xff] %v201_v22  ;;  %v224_v24 = vpop.f32.mrf.mxu3 }
  0xc5   :  { %v160_v27 = vadd.f32 %v159_v23, %v527_v25  ;;  %v225_v28 = vadd.f32 %v224_v24, %v529_v26 }
  0xc7   :  { %242 = vst [vmem:[#allocation2 + $0x78] sm:$0xff] %v160_v27 }
  0xc8   :  { %258 = vst [vmem:[#allocation4 + $0x78] sm:$0xff] %v225_v28  ;;  %271 = dma.vmem_to_hbm [thread:$0]  %s264_s2, 2048, %s266_s13, [#allocation3], %s393_s3, %s393_s3, %s394_s19  }
  0xc9   :  { %284 = dma.vmem_to_hbm [thread:$0]  %s277_s15, 2048, %s279_s18, [#allocation5], %s393_s3, %s393_s3, %s394_s19  }
  0xca   :  { %387 = dma.done.wait [#allocation3], 2048  }
  0xcb   :  { %388 = vsyncadd [#allocation3], 4294965248 }
  0xcc   :  { %389 = dma.done.wait [#allocation5], 2048  }
  0xcd   :  { %390 = vsyncadd [#allocation5], 4294965248 }
  0xce   :  { %293 = vsyncpa [#allocation3], 1 }
  0xcf   :  { %294 = vsyncpa [#allocation5], 1 }

</bundles_post_ra>
